<compile_context>
chip_gen: v5e
topology: v5e:2x2
jax: 0.10.0
libtpu: 0.0.40
codegen_flags: <defaults>
</compile_context>

<pallas_src>
import math

import jax
import jax.numpy as jnp
from jax.experimental import pallas as pl
from jax.experimental.pallas import tpu as pltpu


# ----------------------------- kernels --------------------------------------


def _pe_add_kernel_2d(x_ref, pe_ref, o_ref):
    # x_ref / pe_ref / o_ref: (TR, L) tiles (batch dim squeezed away).
    o_ref[...] = x_ref[...] + pe_ref[...]


def _pe_add_kernel_3d(x_ref, pe_ref, o_ref):
    # x_ref / o_ref: (TB, TR, L) tile; pe_ref: (TR, L), broadcast over batch.
    o_ref[...] = x_ref[...] + pe_ref[...][None, :, :]


# ----------------------------- PE table -------------------------------------


def make_pe_table(seq_len: int, d_model: int) -> jnp.ndarray:
    """Builds the sinusoidal PE buffer exactly like the PyTorch __init__ (f32)."""
    position = jnp.arange(0, seq_len, dtype=jnp.float32)[:, None]            # (S, 1)
    div_term = jnp.exp(
        jnp.arange(0, d_model, 2, dtype=jnp.float32)
        * (-math.log(10000.0) / d_model)
    )                                                                         # (ceil(D/2),)
    angles = position * div_term                                              # (S, ceil(D/2))
    pe = jnp.zeros((seq_len, d_model), dtype=jnp.float32)
    pe = pe.at[:, 0::2].set(jnp.sin(angles))
    # Guard the odd-d_model case (cos has floor(D/2) target columns).
    pe = pe.at[:, 1::2].set(jnp.cos(angles[:, : d_model // 2]))
    return pe                                                                 # (S, D)


# ----------------------------- sizing helpers --------------------------------


def _sublane_multiple(dtype) -> int:
    return {4: 8, 2: 16, 1: 32}.get(jnp.dtype(dtype).itemsize, 8)


def _vmem_budgets() -> tuple[int, int]:
    """Returns (tile-set budget bytes, vmem_limit_bytes), generation aware."""
    phys = None
    try:
        info = pltpu.get_tpu_info()
        for name in ("vmem_capacity_bytes", "vmem_size_bytes", "vmem_bytes"):
            phys = getattr(info, name, None)
            if phys:
                break
    except Exception:
        phys = None
    if not phys:
        phys = 64 * 1024 * 1024                # conservative: assume v7x-sized VMEM
    if phys >= 128 * 1024 * 1024:              # v4 / v5e / v6e: 128 MiB VMEM
        return 40 * 1024 * 1024, 96 * 1024 * 1024
    return 20 * 1024 * 1024, 44 * 1024 * 1024  # v7x: 64 MiB physical


def _fold_lanes(S: int, D: int) -> tuple[int, int]:
    """(rows_per_batch, lane_width): reshape (S, D) -> (S/k, k*D) with
    k*D % 128 == 0 when the seq length folds cleanly, else keep (S, D)."""
    k = 128 // math.gcd(D, 128)
    if k > 1 and S % k == 0:
        return S // k, k * D
    return S, D


def _largest_divisor_at_most(n: int, cap: int) -> int:
    cap = max(1, min(n, cap))
    for t in range(cap, 0, -1):
        if n % t == 0:
            return t
    return 1


def _pick_row_tile(R: int, L: int, itemsize: int, sublane: int, budget: int) -> int:
    """Rows per tile. Per-step resident tile set ~ 6 * TR * L * itemsize
    (x, out and pe are each double-buffered by the pipeline)."""
    max_rows = max(1, budget // (6 * L * itemsize))
    if R <= max_rows:
        return R                                   # full extent: always legal
    # Largest divisor of R that is a multiple of the dtype sublane count.
    t = (max_rows // sublane) * sublane
    while t >= sublane:
        if R % t == 0:
            return t
        t -= sublane
    # Last resort (odd row counts): largest divisor that fits the budget.
    return _largest_divisor_at_most(R, max_rows)


# ----------------------------- forward wrapper --------------------------------


def positional_encoding_forward(x: jnp.ndarray, pe: jnp.ndarray,
                                *, tile_budget_bytes: int | None = None) -> jnp.ndarray:
    """x: (B, S, D); pe: (seq_len, D) with S <= seq_len. Returns x + pe[:S]."""
    B, S, D = x.shape
    dtype = x.dtype
    itemsize = jnp.dtype(dtype).itemsize

    budget, vmem_limit = _vmem_budgets()
    if tile_budget_bytes is not None:
        budget = tile_budget_bytes

    # Mirrors self.pe[:, :x.shape[1], :]; one-time cast to x's dtype in the
    # wrapper (note: for bf16 inputs the add runs in bf16, PyTorch promotes).
    pe_sliced = pe[:S, :].astype(dtype)

    # Lane-dense 2-D view of the per-batch (S, D) slab.
    R, L = _fold_lanes(S, D)
    x3 = x.reshape(B, R, L)
    pe2 = pe_sliced.reshape(R, L)

    sublane = _sublane_multiple(dtype)
    TR = _pick_row_tile(R, L, itemsize, sublane, budget)

    # Fold several batch elements into one grid step when a whole per-batch
    # row block fits (short-S / large-B case).
    TB = 1
    if TR == R:
        per_batch = R * L * itemsize
        max_tb = max(1, (budget - 2 * per_batch) // (4 * per_batch))
        TB = _largest_divisor_at_most(B, max_tb)

    # Row tiles outermost (megacore sharding), batch innermost so the PE
    # block index is constant across the inner loop (PE stays resident).
    grid = (R // TR, B // TB)

    if TB == 1:
        kernel = _pe_add_kernel_2d
        x_spec = pl.BlockSpec((pl.Squeezed(), TR, L), lambda s, b: (b, s, 0))
        o_spec = pl.BlockSpec((pl.Squeezed(), TR, L), lambda s, b: (b, s, 0))
    else:
        kernel = _pe_add_kernel_3d
        x_spec = pl.BlockSpec((TB, TR, L), lambda s, b: (b, s, 0))
        o_spec = pl.BlockSpec((TB, TR, L), lambda s, b: (b, s, 0))
    pe_spec = pl.BlockSpec((TR, L), lambda s, b: (s, 0))     # batch-invariant

    cost = pl.CostEstimate(
        flops=B * S * D,
        transcendentals=0,
        bytes_accessed=2 * B * S * D * itemsize + S * D * itemsize,
    )

    out3 = pl.pallas_call(
        kernel,
        out_shape=jax.ShapeDtypeStruct((B, R, L), dtype),
        grid_spec=pl.GridSpec(
            grid=grid,
            in_specs=[x_spec, pe_spec],
            out_specs=o_spec,
        ),
        input_output_aliases={0: 0},       # result may alias / overwrite x
        compiler_params=pltpu.CompilerParams(
            dimension_semantics=("parallel", "parallel"),
            vmem_limit_bytes=vmem_limit,
        ),
        cost_estimate=cost,
    )(x3, pe2)

    # Dropout in eval mode is identity.
    return out3.reshape(B, S, D)


# ----------------------------- self-test --------------------------------------


if __name__ == "__main__":
    root = jax.random.PRNGKey(0)

    def _run_case(idx, batch, seq, d_model, seq_len, budget=None):
        key = jax.random.fold_in(root, idx)
        x = jax.random.normal(key, (batch, seq, d_model), dtype=jnp.float32)
        pe = make_pe_table(seq_len, d_model)
        ref = x + pe[None, :seq, :]
        out = positional_encoding_forward(x, pe, tile_budget_bytes=budget)
        out = jax.block_until_ready(out)
        assert out.shape == (batch, seq, d_model)
        assert jnp.allclose(out, ref, atol=1e-5), f"mismatch vs reference in case {idx}"

    # 1) Module constants: d_model=16, seq_len=10, x seq=8 (lane-folded to L=128,
    #    multiple batches per grid step).
    _run_case(1, batch=2, seq=8, d_model=16, seq_len=10)
    # 2) d_model=64 folded (k=2) to a 128-lane layout.
    _run_case(2, batch=2, seq=16, d_model=64, seq_len=16)
    # 3) Tiny tile budget -> exercises the row-tiling / squeezed-batch path
    #    (TR < R, TB == 1, 2x2 grid).
    _run_case(3, batch=2, seq=32, d_model=64, seq_len=32, budget=24576)
    # 4) d_model=48, seq=10: no clean lane fold -> fallback layout with the
    #    full-extent last dim.
    _run_case(4, batch=2, seq=10, d_model=48, seq_len=12)

    print("KERNEL_OK")
</pallas_src>

<mosaic_0001>
module attributes {stable_mosaic.version = 11 : i64} {
  func.func @_pe_add_kernel_3d(%arg0: i32, %arg1: i32, %arg2: memref<2x1x128xf32, #tpu.memory_space<vmem>>, %arg3: memref<1x128xf32, #tpu.memory_space<vmem>>, %arg4: memref<2x1x128xf32, #tpu.memory_space<vmem>>) attributes {dimension_semantics = [#tpu.dimension_semantics<parallel>, #tpu.dimension_semantics<parallel>], iteration_bounds = array<i64: 1, 1>, scalar_prefetch = 0 : i64, scratch_operands = 0 : i64, tpu.core_type = #tpu.core_type<tc>, window_params = [{transform_indices = @transform_0, window_bounds = array<i64: 2, 1, 128>}, {transform_indices = @transform_1, window_bounds = array<i64: 1, 128>}, {transform_indices = @transform_2, window_bounds = array<i64: 2, 1, 128>}]} {
    %c0 = arith.constant 0 : index
    %c0_0 = arith.constant 0 : index
    %c0_1 = arith.constant 0 : index
    %0 = vector.load %arg2[%c0, %c0_0, %c0_1] : memref<2x1x128xf32, #tpu.memory_space<vmem>>, vector<2x1x128xf32>
    %c0_2 = arith.constant 0 : index
    %c0_3 = arith.constant 0 : index
    %1 = vector.load %arg3[%c0_2, %c0_3] : memref<1x128xf32, #tpu.memory_space<vmem>>, vector<1x128xf32>
    %2 = vector.shape_cast %1 : vector<1x128xf32> to vector<1x1x128xf32>
    %3 = vector.broadcast %2 : vector<1x1x128xf32> to vector<2x1x128xf32>
    %4 = arith.addf %0, %3 : vector<2x1x128xf32>
    %c0_4 = arith.constant 0 : index
    %c0_5 = arith.constant 0 : index
    %c0_6 = arith.constant 0 : index
    %5 = vector.load %arg4[%c0_4, %c0_5, %c0_6] : memref<2x1x128xf32, #tpu.memory_space<vmem>>, vector<2x1x128xf32>
    tpu.vector_store %arg4[%c0_4, %c0_5, %c0_6], %4 {strides = array<i32>} : memref<2x1x128xf32, #tpu.memory_space<vmem>>, vector<2x1x128xf32>,
    return
  }
  func.func @transform_0(%arg0: i32, %arg1: i32) -> (i32, i32, i32) {
    %c0_i32 = arith.constant 0 : i32
    %c0_i32_0 = arith.constant 0 : i32
    return %arg1, %arg0, %c0_i32 : i32, i32, i32
  }
  func.func @transform_1(%arg0: i32, %arg1: i32) -> (i32, i32) {
    %c0_i32 = arith.constant 0 : i32
    %c0_i32_0 = arith.constant 0 : i32
    return %arg0, %c0_i32 : i32, i32
  }
  func.func @transform_2(%arg0: i32, %arg1: i32) -> (i32, i32, i32) {
    %c0_i32 = arith.constant 0 : i32
    %c0_i32_0 = arith.constant 0 : i32
    return %arg1, %arg0, %c0_i32 : i32, i32, i32
  }
}

</mosaic_0001>

<bundles_post_ra>
// kernel: tpu_custom_call.1
= control target key start
LH: loop header
LB: loop body
LE: loop exit
PB: predicated region body
PF: predicated region fallthrough
CT: control target
= control target key end

     0   :  { %7 = vsyncpa [#allocation3], 0  ;;  %s138_s0 = inlined_call_operand.hbm [shape: f32[2,1,128], index: 0, kind: input, shape index: {}, may-alias: {0,2}]   ;;  %s139_s1 = inlined_call_operand.vmem [shape: f32[1,128], index: 1, kind: input, shape index: {}]   ;;  %s140_s2 = inlined_call_operand.hbm [shape: f32[2,1,128], index: 2, kind: output, shape index: {}, may-alias: {0,2}]  }
   0x1   :  { %8 = vsyncpa [#allocation4], 0  ;;  %s13_s11 = sshll.u32 %s138_s0, 4  ;;  %s110_s12 = smov [#allocation2]   ;;  %s14_s11 = int_to_ptr.hbm [resolvable:$true] %s13_s11 }
   0x2   :  { %s15_s13 = sshll.u32 %s110_s12, 4  ;;  %s111_s14 = smov 16   ;;  %s16_s13 = int_to_ptr.vmem [resolvable:$true] %s15_s13 }
   0x3   :  { %s112_s15 = smov 1  }
   0x4   :  { %21 = dma.hbm_to_vmem [thread:$0]  %s14_s11, 32, %s16_s13, [#allocation3], %s111_s14, %s111_s14, %s112_s15  }
   0x5   :  { %106 = dma.done.wait [#allocation3], 32  }
   0x6   :  { %107 = vsyncadd [#allocation3], 4294967264  ;;  %s113_s16 = smov [#allocation5]   ;;  %s41_s20 = sshll.u32 %s140_s2, 4  ;;  %v28_v0 = vld [vmem:[#allocation2] sm:$0x1]  ;;  %s42_s20 = int_to_ptr.hbm [resolvable:$true] %s41_s20 }
   0x7   :  { %s39_s17 = sshll.u32 %s113_s16, 4  ;;  %v30_v1 = vld [vmem:[%s139_s1] sm:$0x1]  ;;  %v29_v2 = vld [vmem:[#allocation2 + $0x1] sm:$0x1]  ;;  %s40_s17 = int_to_ptr.vmem [resolvable:$true] %s39_s17 }
   0x8   :  { %v31_v3 = vadd.f32 %v30_v1, %v28_v0  ;;  %v32_v4 = vadd.f32 %v30_v1, %v29_v2 }
   0xa   :  { %33 = vst [vmem:[#allocation5] sm:$0x1] %v31_v3 }
   0xb   :  { %34 = vst [vmem:[#allocation5 + $0x1] sm:$0x1] %v32_v4 }
   0xc   :  { %47 = dma.vmem_to_hbm [thread:$0]  %s40_s17, 32, %s42_s20, [#allocation4], %s111_s14, %s111_s14, %s112_s15  }
   0xd   :  { %108 = dma.done.wait [#allocation4], 32  }
   0xe   :  { %109 = vsyncadd [#allocation4], 4294967264 }
   0xf   :  { %52 = vsyncpa [#allocation3], 1 }
  0x10   :  { %53 = vsyncpa [#allocation4], 1 }

</bundles_post_ra>
